<compile_context>
chip_gen: v6e
topology: v6e:2x2x1
jax: 0.10.0
libtpu: 0.0.40
codegen_flags: <defaults>
</compile_context>

<pallas_src>
import math

import jax
import jax.numpy as jnp
from jax.experimental import pallas as pl
from jax.experimental.pallas import tpu as pltpu


def _flow_kernel(x_ref, w_ref, z_ref, s1_ref, s2_ref):
    # x_ref: (BC, TL)   w_ref: (BC, BC)   z_ref: (BC, TL)
    # s1_ref / s2_ref: (1, BC, 1) per-grid-step row partial sums (VMEM).
    z = jnp.dot(w_ref[...], x_ref[...], preferred_element_type=jnp.float32)
    z_ref[...] = z                                            # lane-dense store
    s1_ref[0] = jnp.sum(z, axis=-1, keepdims=True)            # one lane-axis reduce
    s2_ref[0] = jnp.sum(z * z, axis=-1, keepdims=True)        # one VPU pass + reduce


def _pick_lane_tile(HW, BC, budget_bytes=8 << 20):
    """Largest lane tile that divides HW, is a multiple of 128, and keeps the
    double-buffered (x + z) blocks under `budget_bytes` (fits every generation's
    default scoped-VMEM limit)."""
    if HW % 128 != 0:
        return HW  # full-extent last dim satisfies the (8,128) BlockSpec rule
    bytes_per_lane = 2 * 2 * BC * 4  # (x + z) * double-buffer * f32
    max_lanes = max(128, budget_bytes // bytes_per_lane)
    if HW <= max_lanes:
        return HW
    best = 128
    d = 128
    while d <= max_lanes:
        if HW % d == 0:
            best = d
        d += 128
    return best


def noise_model_forward(x, weights):
    """Forward pass of NoiseModel (arch = K x C1x1).

    Args:
      x: (B, C, H, W) float32 — noisy input (NCHW, like the PyTorch module).
      weights: (K, C, C) float32 — invertible 1x1-conv weights.
    Returns:
      z:         (B, C, H, W) float32
      objective: (B,)         float32  (sum of per-layer log|det J^{-1}|)
      log_z:     (B,)         float32  (base_dist.log_prob(z))
      sum_z:     (B,)         float32  (per-batch sum of z, for mean/var)
      sumsq_z:   (B,)         float32  (per-batch sum of z**2, for mean/var)
    """
    B, C, H, W = x.shape
    HW = H * W
    BC = B * C
    K = weights.shape[0]
    w = weights.astype(jnp.float32)

    # Fold the chain of 1x1-conv weights: W_total = W_{K-1} @ ... @ W_0 (tiny CxC glue).
    # TODO(synk): when weights are fixed (inference), hoist w_total / w_block / slogdet
    # out of the jitted hot path entirely.
    w_total = w[0]
    for k in range(1, K):
        w_total = w[k] @ w_total
    # Block-diagonal expansion so the kernel operates on a pure-reshape (B*C, HW) slab.
    w_block = jnp.kron(jnp.eye(B, dtype=jnp.float32), w_total)  # (BC, BC)

    x2 = x.astype(jnp.float32).reshape(BC, HW)  # pure reshape — no transpose, no copy

    tl = _pick_lane_tile(HW, BC)
    g = HW // tl

    z_flat, s1, s2 = pl.pallas_call(
        _flow_kernel,
        grid=(g,),
        in_specs=[
            pl.BlockSpec((BC, tl), lambda i: (0, i)),
            pl.BlockSpec((BC, BC), lambda i: (0, 0)),
        ],
        out_specs=(
            pl.BlockSpec((BC, tl), lambda i: (0, i)),
            pl.BlockSpec((1, BC, 1), lambda i: (i, 0, 0)),
            pl.BlockSpec((1, BC, 1), lambda i: (i, 0, 0)),
        ),
        out_shape=(
            jax.ShapeDtypeStruct((BC, HW), jnp.float32),
            jax.ShapeDtypeStruct((g, BC, 1), jnp.float32),
            jax.ShapeDtypeStruct((g, BC, 1), jnp.float32),
        ),
        compiler_params=pltpu.CompilerParams(
            dimension_semantics=("parallel",),  # shards lane blocks across v7x's 2 TCs
        ),
    )(x2, w_block)

    z = z_flat.reshape(B, C, H, W)  # pure reshape back — no transpose

    # Final fold of the tiny (g, BC) partial-sum slabs: a handful of adds in XLA.
    sum_z = jnp.sum(s1[:, :, 0], axis=0).reshape(B, C).sum(axis=1)
    sumsq_z = jnp.sum(s2[:, :, 0], axis=0).reshape(B, C).sum(axis=1)

    # StandardNormal.log_prob via sum_except_batch, derived from sum(z^2):
    log_z = (
        jnp.float32(C * HW) * jnp.float32(-0.5 * math.log(2.0 * math.pi))
        - 0.5 * sumsq_z
    )

    # objective: each Conv2d1x1 contributes H*W * log|det W_k|, identical per batch
    # element. |det(prod W_k)| = prod |det W_k|, so ONE slogdet of the folded weight.
    # TODO(synk): verify sign convention against the PyTorch Conv2d1x1 bijector
    # (orthogonal-init test weights have logabsdet ~ 0, so a sign flip is untestable).
    _, logabsdet_total = jnp.linalg.slogdet(w_total)
    objective = jnp.full((B,), jnp.float32(HW) * logabsdet_total, jnp.float32)

    return z, objective, log_z, sum_z, sumsq_z


def noise_model_loss(x, weights):
    """NoiseModel.loss / _loss semantics (is_raw=True): returns (mean(nll), sd_z)."""
    B, C, H, W = x.shape
    N = C * H * W
    z, objective, log_z, sum_z, sumsq_z = noise_model_forward(x, weights)
    objective = objective + log_z
    nobj = -objective
    # torch.var(dim=[1,2,3]) is unbiased (correction=1).
    # TODO(synk): (sumsq - sum^2/N)/(N-1) in f32 can cancel if z drifts far from zero
    # mean; fine for ~N(0,1) flow outputs at these sizes.
    var_z = (sumsq_z - sum_z * sum_z / N) / (N - 1)
    sd_z = jnp.mean(jnp.sqrt(var_z))
    return z, objective, jnp.mean(nobj), sd_z


def _reference_forward(x, weights):
    """Pure-JAX reference for correctness checking."""
    B, C, H, W = x.shape
    z = x.reshape(B, C, H * W)
    for k in range(weights.shape[0]):
        z = jnp.einsum("ij,bjs->bis", weights[k], z)
    z = z.reshape(B, C, H, W)
    log_base = -0.5 * math.log(2.0 * math.pi)
    log_z = jnp.sum(log_base - 0.5 * z * z, axis=(1, 2, 3))
    sum_z = jnp.sum(z, axis=(1, 2, 3))
    sumsq_z = jnp.sum(z * z, axis=(1, 2, 3))
    return z, log_z, sum_z, sumsq_z


if __name__ == "__main__":
    key = jax.random.PRNGKey(0)
    k_x, k_clean, k_w = jax.random.split(key, 3)

    B, C, H, W = 2, 4, 16, 16
    NUM_LAYERS = 3  # arch = "C1x1|C1x1|C1x1"

    x = jax.random.normal(k_x, (B, C, H, W), jnp.float32)
    clean = jax.random.normal(k_clean, (B, C, H, W), jnp.float32)  # kwargs['clean']:
    # unused by Conv2d1x1 bijectors (it only feeds Conditional* layers).

    # Deterministic orthogonal init (Glow-style) for each invertible 1x1 conv.
    raw = jax.random.normal(k_w, (NUM_LAYERS, C, C), jnp.float32)
    weights = jnp.stack([jnp.linalg.qr(raw[k])[0] for k in range(NUM_LAYERS)])

    z, objective, log_z, sum_z, sumsq_z = jax.jit(noise_model_forward)(x, weights)
    jax.block_until_ready((z, objective, log_z, sum_z, sumsq_z))

    z_ref, log_z_ref, sum_ref, sumsq_ref = _reference_forward(x, weights)
    assert jnp.allclose(z, z_ref, atol=1e-4, rtol=1e-4), "z mismatch"
    assert jnp.allclose(log_z, log_z_ref, atol=1e-2, rtol=1e-4), "log_prob mismatch"
    assert jnp.allclose(sum_z, sum_ref, atol=1e-2, rtol=1e-4), "sum(z) mismatch"
    assert jnp.allclose(sumsq_z, sumsq_ref, atol=1e-2, rtol=1e-4), "sum(z^2) mismatch"

    z2, obj2, mean_nll, sd_z = jax.jit(noise_model_loss)(x, weights)
    jax.block_until_ready((mean_nll, sd_z))

    print("KERNEL_OK")
</pallas_src>

<mosaic_0001>
module attributes {stable_mosaic.version = 11 : i64} {
  func.func @_flow_kernel(%arg0: i32, %arg1: memref<8x256xf32, #tpu.memory_space<vmem>>, %arg2: memref<8x8xf32, #tpu.memory_space<vmem>>, %arg3: memref<8x256xf32, #tpu.memory_space<vmem>>, %arg4: memref<1x8x1xf32, #tpu.memory_space<vmem>>, %arg5: memref<1x8x1xf32, #tpu.memory_space<vmem>>) attributes {dimension_semantics = [#tpu.dimension_semantics<parallel>], iteration_bounds = array<i64: 1>, scalar_prefetch = 0 : i64, scratch_operands = 0 : i64, tpu.core_type = #tpu.core_type<tc>, window_params = [{transform_indices = @transform_0, window_bounds = array<i64: 8, 256>}, {pipeline_mode = #tpu.pipeline_mode<synchronous>, transform_indices = @transform_1, window_bounds = array<i64: 8, 8>}, {transform_indices = @transform_2, window_bounds = array<i64: 8, 256>}, {transform_indices = @transform_3, window_bounds = array<i64: 1, 8, 1>}, {transform_indices = @transform_4, window_bounds = array<i64: 1, 8, 1>}]} {
    %c0 = arith.constant 0 : index
    %c0_0 = arith.constant 0 : index
    %0 = vector.load %arg2[%c0, %c0_0] : memref<8x8xf32, #tpu.memory_space<vmem>>, vector<8x8xf32>
    %c0_1 = arith.constant 0 : index
    %c0_2 = arith.constant 0 : index
    %1 = vector.load %arg1[%c0_1, %c0_2] : memref<8x256xf32, #tpu.memory_space<vmem>>, vector<8x256xf32>
    %cst = arith.constant dense<0.000000e+00> : vector<8x256xf32>
    %2 = tpu.matmul %0, %1, %cst {dimension_numbers = #tpu.dot_dimension_numbers<[1], [0], [0], [1], [0, 0, 1, 1], [], []>} : vector<8x8xf32>, vector<8x256xf32>, vector<8x256xf32> -> vector<8x256xf32>
    %c0_3 = arith.constant 0 : index
    %c0_4 = arith.constant 0 : index
    %3 = vector.load %arg3[%c0_3, %c0_4] : memref<8x256xf32, #tpu.memory_space<vmem>>, vector<8x256xf32>
    tpu.vector_store %arg3[%c0_3, %c0_4], %2 {strides = array<i32>} : memref<8x256xf32, #tpu.memory_space<vmem>>, vector<8x256xf32>,
    %cst_5 = arith.constant dense<0.000000e+00> : vector<8xf32>
    %4 = vector.multi_reduction <add>, %2, %cst_5 [1] : vector<8x256xf32> to vector<8xf32>
    %5 = vector.shape_cast %4 : vector<8xf32> to vector<8x1xf32>
    %c0_6 = arith.constant 0 : index
    %c0_7 = arith.constant 0 : index
    %c0_8 = arith.constant 0 : index
    %6 = vector.load %arg4[%c0_6, %c0_7, %c0_8] : memref<1x8x1xf32, #tpu.memory_space<vmem>>, vector<1x8x1xf32>
    %7 = vector.shape_cast %6 : vector<1x8x1xf32> to vector<8x1xf32>
    %8 = vector.shape_cast %5 : vector<8x1xf32> to vector<1x8x1xf32>
    tpu.vector_store %arg4[%c0_6, %c0_7, %c0_8], %8 {strides = array<i32>} : memref<1x8x1xf32, #tpu.memory_space<vmem>>, vector<1x8x1xf32>,
    %9 = arith.mulf %2, %2 : vector<8x256xf32>
    %cst_9 = arith.constant dense<0.000000e+00> : vector<8xf32>
    %10 = vector.multi_reduction <add>, %9, %cst_9 [1] : vector<8x256xf32> to vector<8xf32>
    %11 = vector.shape_cast %10 : vector<8xf32> to vector<8x1xf32>
    %c0_10 = arith.constant 0 : index
    %c0_11 = arith.constant 0 : index
    %c0_12 = arith.constant 0 : index
    %12 = vector.load %arg5[%c0_10, %c0_11, %c0_12] : memref<1x8x1xf32, #tpu.memory_space<vmem>>, vector<1x8x1xf32>
    %13 = vector.shape_cast %12 : vector<1x8x1xf32> to vector<8x1xf32>
    %14 = vector.shape_cast %11 : vector<8x1xf32> to vector<1x8x1xf32>
    tpu.vector_store %arg5[%c0_10, %c0_11, %c0_12], %14 {strides = array<i32>} : memref<1x8x1xf32, #tpu.memory_space<vmem>>, vector<1x8x1xf32>,
    return
  }
  func.func @transform_0(%arg0: i32) -> (i32, i32) {
    %c0_i32 = arith.constant 0 : i32
    %c0_i32_0 = arith.constant 0 : i32
    return %c0_i32, %arg0 : i32, i32
  }
  func.func @transform_1(%arg0: i32) -> (i32, i32) {
    %c0_i32 = arith.constant 0 : i32
    %c0_i32_0 = arith.constant 0 : i32
    %c0_i32_1 = arith.constant 0 : i32
    return %c0_i32, %c0_i32_0 : i32, i32
  }
  func.func @transform_2(%arg0: i32) -> (i32, i32) {
    %c0_i32 = arith.constant 0 : i32
    %c0_i32_0 = arith.constant 0 : i32
    return %c0_i32, %arg0 : i32, i32
  }
  func.func @transform_3(%arg0: i32) -> (i32, i32, i32) {
    %c0_i32 = arith.constant 0 : i32
    %c0_i32_0 = arith.constant 0 : i32
    %c0_i32_1 = arith.constant 0 : i32
    return %arg0, %c0_i32, %c0_i32_0 : i32, i32, i32
  }
  func.func @transform_4(%arg0: i32) -> (i32, i32, i32) {
    %c0_i32 = arith.constant 0 : i32
    %c0_i32_0 = arith.constant 0 : i32
    %c0_i32_1 = arith.constant 0 : i32
    return %arg0, %c0_i32, %c0_i32_0 : i32, i32, i32
  }
}

</mosaic_0001>

<bundles_post_ra>
// kernel: custom-call.2
= control target key start
LH: loop header
LB: loop body
LE: loop exit
PB: predicated region body
PF: predicated region fallthrough
CT: control target
= control target key end

     0   :  { %5 = vsyncpa [#allocation6], 0  ;;  %s549_s0 = inlined_call_operand.vmem [shape: f32[4,4], index: 0, kind: input, shape index: {}]   ;;  %s550_s1 = inlined_call_operand.vmem [shape: f32[4,4], index: 1, kind: output, shape index: {0}]   ;;  %s551_s2 = inlined_call_operand.hbm [shape: s32[4], index: 2, kind: output, shape index: {1}]   ;;  %s552_s3 = inlined_call_operand.hbm [shape: s32[4], index: 3, kind: output, shape index: {2}]  }
   0x1   :  { %6 = vsyncpa [#allocation9], 0  ;;  %v68_v0 = vld [vmem:[%s549_s0] sm:$0xf]  ;;  %v78_v1 = vlaneseq  ;;  %v478_v2 = vmov 0   ;;  %s508_s14 = smov 0  }
   0x2   :  { %69 = vst [vmem:[#allocation1] sm:$0xf] %v68_v0  ;;  %77 = vst [vmem:[#allocation4] sm:$0x1] %v478_v2 }
   0x3   :  { %v505_v3 = vshrl.u32 %v78_v1, 7 }
   0x5   :  { %82 = vst [vmem:[#allocation10] sm:$0xff] %v505_v3 }
   0x9   :  { %v73_v4 = vld [vmem:[#allocation1] sm:$0xf] }
   0xa   :  { %74 = vst [vmem:[#allocation0] sm:$0xf] %v73_v4 }
  0x11   :  { %v75_v5 = vld [vmem:[#allocation0] sm:$0xff] }
  0x12   :  { %76 = vst [vmem:[#allocation2] sm:$0xff] %v75_v5 }
  0x13 LB: > { %vm98_vm0 = vcmp.lt.s32.totalorder %v505_v3, 4  ;;  %v515_v8 = vstv %s476_s14  ;;  %s139_s0 = ssub.s32 128, %s476_s14  ;;  %v145_v38 = vand.u32 127, %v78_v1  ;;  %v148_v40 = vld [vmem:[#allocation4] ss:$0 sm:$0xff]  ;;  %s151_s15 = scalar_lea.vmem [#allocation2], %s476_s14  ;;  %s476_s14 = sphi %s508_s14, %s88_s14  }
  0x14   : > { %vm97_vm1 = vcmp.ge.s32.totalorder %v505_v3, %v515_v8  ;;  %s157_s17 = scalar_lea.vmem [#allocation10], %s476_s14  ;;  %vm177_vm15 = vcmp.gt.s32.totalorder %v505_v3, %v515_v8  ;;  %s88_s14 = sadd.s32 1, %s476_s14  }
  0x15   : > { %vm99_vm3 = vmand %vm97_vm1, %vm98_vm0  ;;  %vm169_vm12 = vcmp.gt.s32.totalorder %v145_v38, %v515_v8  ;;  %vm146_vm13 = vcmp.eq.s32.totalorder %v145_v38, %v515_v8  ;;  %v159_v42 = vld [vmem:[%s157_s17] ss:$0 sm:$0xff]  ;;  %p85_p0 = scmp.ge.s32.totalorder %s88_s14, 4  }
  0x16   : > { %vm181_vm1 = vmand %vm177_vm15, %vm146_vm13  ;;  %s479_s20 = smov (%p85_p0), [#allocation5]  }
  0x17   :  { %s329_s21 = sshll.u32 (%p85_p0), %s479_s20, 4  ;;  %s330_s21 = int_to_ptr.vmem [resolvable:$true] %s329_s21 }
  0x18   :  { %s426_s22 = scalar_lea.vmem (%p85_p0), %s330_s21, 16  ;;  %s430_s23 = scalar_lea.vmem (%p85_p0), %s330_s21, 32 }
  0x19   : > { %v93_v6 = vld [vmem:[#allocation2] sm:$0xff]  ;;  %v153_v41 = vld [vmem:[%s151_s15] ss:$0 sm:$0xff]  ;;  %p427_p1 = scmp.ne.s32.totalorder (%p85_p0), %s330_s21, %s426_s22  ;;  %p431_p2 = scmp.lt.s32.totalorder (%p85_p0), %s330_s21, %s330_s21 }
  0x1a   : > { %v94_v7 = vand.u32 2147483647, %v93_v6  ;;  %p432_p3 = scmp.lt.s32.totalorder (%p85_p0), %s430_s23, %s426_s22 }
  0x1c   : > { %vm407_vm2 = vcmp.gt.f32.partialorder %v94_v7, -inf  ;;  %p433_p4 = por (%p85_p0), %p432_p3, %p431_p2 }
  0x1d   : > { %vm101_vm4 = vmand %vm99_vm3, %vm407_vm2 }
  0x1e   : > { %v102_v9 = vsel %vm101_vm4, %v505_v3, %v515_v8  ;;  %v103_v10 = vsel %vm101_vm4, %v94_v7, -inf  ;;  %p434_p5 = pnand (%p85_p0), %p433_p4, %p427_p1 }
  0x1f   : > { %v104_v11 = vrot.slane %v103_v10, 1  ;;  %v105_v12 = vrot.slane %v102_v9, 1 }
  0x21   : > { %vm106_vm5 = vcmp.ge.f32.partialorder %v104_v11, %v103_v10  ;;  %v109_v13 = vrot.slane %v104_v11, 1  ;;  %v110_v14 = vrot.slane %v105_v12, 1 }
  0x22   : > { %v107_v15 = vsel %vm106_vm5, %v104_v11, %v103_v10  ;;  %v108_v16 = vsel %vm106_vm5, %v105_v12, %v102_v9 }
  0x23   : > { %vm111_vm6 = vcmp.ge.f32.partialorder %v109_v13, %v107_v15  ;;  %v114_v17 = vrot.slane %v109_v13, 1  ;;  %v115_v18 = vrot.slane %v110_v14, 1 }
  0x24   : > { %v112_v19 = vsel %vm111_vm6, %v109_v13, %v107_v15  ;;  %v113_v20 = vsel %vm111_vm6, %v110_v14, %v108_v16 }
  0x25   : > { %vm116_vm7 = vcmp.ge.f32.partialorder %v114_v17, %v112_v19  ;;  %v119_v21 = vrot.slane %v114_v17, 1  ;;  %v120_v22 = vrot.slane %v115_v18, 1 }
  0x26   : > { %v117_v23 = vsel %vm116_vm7, %v114_v17, %v112_v19  ;;  %v118_v24 = vsel %vm116_vm7, %v115_v18, %v113_v20 }
  0x27   : > { %vm121_vm8 = vcmp.ge.f32.partialorder %v119_v21, %v117_v23  ;;  %v124_v25 = vrot.slane %v119_v21, 1  ;;  %v125_v26 = vrot.slane %v120_v22, 1 }
  0x28   : > { %v122_v27 = vsel %vm121_vm8, %v119_v21, %v117_v23  ;;  %v123_v28 = vsel %vm121_vm8, %v120_v22, %v118_v24 }
  0x29   : > { %vm126_vm9 = vcmp.ge.f32.partialorder %v124_v25, %v122_v27  ;;  %v129_v29 = vrot.slane %v124_v25, 1  ;;  %v130_v30 = vrot.slane %v125_v26, 1 }
  0x2a   : > { %v127_v31 = vsel %vm126_vm9, %v124_v25, %v122_v27  ;;  %v128_v32 = vsel %vm126_vm9, %v125_v26, %v123_v28 }
  0x2b   : > { %vm131_vm10 = vcmp.ge.f32.partialorder %v129_v29, %v127_v31  ;;  %v134_v33 = vrot.slane %v129_v29, 1  ;;  %v135_v34 = vrot.slane %v130_v30, 1 }
  0x2c   : > { %v132_v35 = vsel %vm131_vm10, %v129_v29, %v127_v31  ;;  %v133_v36 = vsel %vm131_vm10, %v130_v30, %v128_v32 }
  0x2d   : > { %vm136_vm11 = vcmp.ge.f32.partialorder %v134_v33, %v132_v35 }
  0x2e   : > { %v138_v37 = vsel %vm136_vm11, %v135_v34, %v133_v36 }
  0x2f   : > { %140 = vrot.lane.b32.xlu0 %v138_v37, %s139_s0 }
  0xa1   : > { %v141_v39 = vpop.permute.xlu0 %140 }
  0xa2   : > { %411 = vpush %v141_v39 }
  0xd3   : > { %s412_s16 = spop %411 }
  0xd4   : > { %v147_v43 = vstv %s412_s16  ;;  %s152_s18 = scalar_lea.vmem [#allocation2], %s412_s16  ;;  %s158_s19 = scalar_lea.vmem [#allocation10], %s412_s16 }
  0xd5   : > { %v154_v44 = vld [vmem:[%s152_s18] ss:$0 sm:$0xff]  ;;  %v149_v46 = vsel %vm146_vm13, %v147_v43, %v148_v40 }
  0xd6   : > { %v160_v45 = vld [vmem:[%s158_s19] ss:$0 sm:$0xff]  ;;  %155 = vst [vmem:[%s152_s18] sm:$0x1] %v153_v41  ;;  %vm163_vm14 = vcmp.ne.f32.partialorder %v154_v44, 0.0  ;;  %150 = vst [vmem:[#allocation4] sm:$0x1] %v149_v46 }
  0xd7   : > { %161 = vst [vmem:[%s158_s19] sm:$0x1] %v159_v42  ;;  %156 = vst [vmem:[%s151_s15] sm:$0x1] %v154_v44  ;;  %v170_v53 = vsel %vm169_vm12, %v154_v44, 0.0 }
  0xd8   : > { %162 = vst [vmem:[%s157_s17] sm:$0x1] %v160_v45  ;;  %vm164_vm0 = vmand %vm146_vm13, %vm163_vm14 }
  0xd9   : > { %v165_v47 = vsel %vm164_vm0, %v154_v44, 1.0 }
  0xda   : > { %v178_v48 = vsel %vm177_vm15, %v165_v47, 1.0 }
  0xdb   : > { %424 = vrcp.f32 %v178_v48 }
  0xdd   :  { %v249_v59 = vld [vmem:[#allocation4] sm:$0x1] (%p85_p0) }
  0xde   : > { %v174_v50 = vld [vmem:[#allocation2] sm:$0xff]  ;;  %252 = vst [vmem:[#allocation5] sm:$0x1] (%p85_p0), %v249_v59 }
  0xdf   :  { %v188_v57 = vld [vmem:[#allocation10] sm:$0xff] (%p85_p0) }
  0xe8   : > { %v425_v49 = vpop.eup %424 }
  0xe9   : > { %v180_v51 = vmul.f32 %v425_v49, %v174_v50 }
  0xeb   : > { %v182_v52 = vsel %vm181_vm1, %v180_v51, 0.0 }
  0xec   : > { %183 = vadd.xlane.f32.xlu0 %v182_v52 }
 0x119   :  { %204 = vxpose.xlu0.b32.start.end [1/1] (short) (narrow) (%p85_p0), %v188_v57, 8 }
 0x175   : > { %v184_v54 = vpop.xlane.xlu0 %183 }
 0x176   : > { %v185_v55 = vmul.f32 %v184_v54, %v170_v53  ;;  %87 = sbr.rel (!%p85_p0) target bundleno = 19 (0x13), region = 134 }
 0x178   : > { %v186_v56 = vsub.f32 %v180_v51, %v185_v55 }
 0x17a   : > { %187 = vst [vmem:[#allocation2] sm:$0xff] %v186_v56 }
 0x181   :  { %v241_v58 = vld [vmem:[#allocation2] sm:$0xf] }
 0x182   :  { %244 = vst [vmem:[#allocation3] sm:$0xf] %v241_v58 }
 0x183   :  { %437 = shalt.err (!%p434_p5)
}
 0x184   :  { %332 = dma.vmem_to_hbm [thread:$0]  %s330_s21, 16, %s551_s2, [#allocation6]  }
 0x185   :  { %s480_s28 = smov [#allocation8]  }
 0x186   :  { %s338_s29 = sshll.u32 %s480_s28, 4  ;;  %s339_s29 = int_to_ptr.vmem [resolvable:$true] %s338_s29 }
 0x187   :  { %s446_s30 = scalar_lea.vmem %s339_s29, 16  ;;  %s450_s4 = scalar_lea.vmem %s339_s29, 32 }
 0x188   :  { %p447_p6 = scmp.ne.s32.totalorder %s339_s29, %s446_s30  ;;  %p451_p7 = scmp.lt.s32.totalorder %s339_s29, %s339_s29 }
 0x189   :  { %v322_v60 = vld [vmem:[#allocation3] sm:$0xf]  ;;  %p452_p8 = scmp.lt.s32.totalorder %s450_s4, %s446_s30 }
 0x18a   :  { %323 = vst [vmem:[%s550_s1] sm:$0xf] %v322_v60 }
 0x18b   :  { %p453_p9 = por %p452_p8, %p451_p7 }
 0x18d   :  { %p454_p10 = pnand %p453_p9, %p447_p6 }
 0x195   :  { %v220_v61 = vpop.trf.xlu0 }
 0x196   :  { %236 = vst [vmem:[#allocation7] sm:$0x1] %v220_v61 }
 0x19d   :  { %v257_v62 = vld [vmem:[#allocation7] sm:$0x1] }
 0x19e   :  { %260 = vst [vmem:[#allocation8] sm:$0x1] %v257_v62 }
 0x19f   :  { %457 = shalt.err (!%p454_p10)
}
 0x1a0   :  { %341 = dma.vmem_to_hbm [thread:$0]  %s339_s29, 16, %s552_s3, [#allocation9]  }
 0x1a1   :  { %470 = dma.done.wait [#allocation6], 16  }
 0x1a2   :  { %471 = vsyncadd [#allocation6], 4294967280 }
 0x1a3   :  { %472 = dma.done.wait [#allocation9], 16  }
 0x1a4   :  { %473 = vsyncadd [#allocation9], 4294967280 }
 0x1a5   :  { %348 = vsyncpa [#allocation6], 1 }
 0x1a6   :  { %349 = vsyncpa [#allocation9], 1 }

// kernel: noise_model_forward.1
= control target key start
LH: loop header
LB: loop body
LE: loop exit
PB: predicated region body
PF: predicated region fallthrough
CT: control target
= control target key end

     0   :  { %v119_v2 = vmov 0.0   ;;  %vm17_vm0 = vcmask 64512   ;;  %vm97_vm1 = vcmask 7168   ;;  %s166_s0 = inlined_call_operand.vmem [shape: f32[8,256], index: 0, kind: input, shape index: {}]   ;;  %s167_s1 = inlined_call_operand.vmem [shape: f32[8,8], index: 1, kind: input, shape index: {}]   ;;  %s168_s2 = inlined_call_operand.vmem [shape: f32[8,256], index: 2, kind: output, shape index: {0}]   ;;  %s169_s3 = inlined_call_operand.vmem [shape: f32[1,8,1], index: 3, kind: output, shape index: {1}]   ;;  %s170_s4 = inlined_call_operand.vmem [shape: f32[1,8,1], index: 4, kind: output, shape index: {2}]  }
   0x1   :  { %v16_v0 = vld [vmem:[%s166_s0 + $0x8] sm:$0xff]  ;;  %v15_v1 = vld [vmem:[%s166_s0] sm:$0xff]  ;;  %85 = vmatprep.mubr.f32.mxu0 %v119_v2 }
   0x2   :  { %v14_v3 = vld [vmem:[%s167_s1] sm:$0xff]  ;;  %51 = vmatprep.subr.mxu0 %v16_v0 }
   0x3   :  { %52 = vmatpush1.msra.mxu0 %v15_v1 }
   0x4   :  { %117 = vmatmul.mubr.msk.f32.vlgmr.msra.gmra.mxu0 %vm17_vm0, %v14_v3 }
  0xc4   :  { %v87_v4 = vpop.f32.mrf.mxu0 }
  0xc5   :  { %92 = vst [vmem:[%s168_s2] sm:$0xff] %v87_v4  ;;  %v99_v8 = vmul.f32 %v87_v4, %v87_v4 }
  0xc6   :  { %v89_v5 = vpop.f32.mrf.mxu0 }
  0xc7   :  { %93 = vst [vmem:[%s168_s2 + $0x8] sm:$0xff] %v89_v5  ;;  %v100_v6 = vmul.f32 %v89_v5, %v89_v5  ;;  %v94_v7 = vadd.f32 %v89_v5, %v87_v4 }
  0xc9   :  { %95 = vadd.xlane.f32.xlu0 %v94_v7  ;;  %v101_v9 = vadd.f32 %v100_v6, %v99_v8 }
  0xcd   :  { %102 = vadd.xlane.f32.xlu0 %v101_v9 }
 0x152   :  { %v96_v10 = vpop.xlane.xlu0 %95 }
 0x153   :  { %98 = vst.msk [vmem:[%s169_s3] sm:$0xff] %vm97_vm1, %v96_v10 }
 0x156   :  { %v103_v11 = vpop.xlane.xlu0 %102 }
 0x157   :  { %104 = vst.msk [vmem:[%s170_s4] sm:$0xff] %vm97_vm1, %v103_v11 }

</bundles_post_ra>
